<compile_context>
chip_gen: v7x
topology: tpu7x:2x2x1
jax: 0.10.0
libtpu: 0.0.40
codegen_flags: <defaults>
</compile_context>

<pallas_src>
import jax
import jax.numpy as jnp
from jax.experimental import pallas as pl
from jax.experimental.pallas import tpu as pltpu


HIDDEN = 20
GP = 32                 # per-gate lane padding (4 gates * 32 = 128 = one f32 vreg)
NGATE = 4
GLANES = NGATE * GP     # 128


def lstm_kernel(x_ref, p_ref, s0_ref, y_ref, sN_ref, xw_ref, hseq_ref):
    """Single-invocation sequential LSTM + Linear(20,1) head.

    x_ref    : (T, in_pad)        zero-padded input sequence
    p_ref    : (in_pad+GP+2, 128) parameter slab:
                 rows [0, in_pad)        Wx  (gate-order i,f,o,g; i/f/o * 0.5)
                 rows [in_pad, in_pad+GP) Wh (rows >= H are zero)
                 row  in_pad+GP          b = b_ih + b_hh (i/f/o * 0.5)
                 row  in_pad+GP+1        head: lanes [0,GP) = w_out (zero-padded),
                                               lane GP = b_out, rest zero
    s0_ref   : (2, GP)            row 0 = h0 (zero-padded), row 1 = c0
    y_ref    : (T, 1)             per-step outputs (== self.out(r_out[0, :]))
    sN_ref   : (2, GP)            row 0 = h_N, row 1 = c_N
    xw_ref   : (T, 128) scratch   hoisted x @ Wx + b
    hseq_ref : (T, GP)  scratch   all hidden states (for the batched head)
    """
    T, in_pad = x_ref.shape
    gp = s0_ref.shape[1]
    glanes = p_ref.shape[1]

    # ---- loop-invariant parameter slices (from the single slab DMA) --------
    wx = p_ref[pl.ds(0, in_pad), :]                  # (in_pad, 128)
    wh = p_ref[pl.ds(in_pad, gp), :]                 # (GP, 128)
    b = p_ref[pl.ds(in_pad + gp, 1), :]              # (1, 128)
    head = p_ref[pl.ds(in_pad + gp + 1, 1), :]       # (1, 128)

    # ---- hoisted input projection into VMEM scratch -------------------------
    # (T, in_pad) @ (in_pad, 128) + (1, 128) -> (T, 128)
    xw_ref[...] = jnp.dot(x_ref[...], wx, preferred_element_type=jnp.float32) + b

    # sigmoid(z) = 0.5*(tanh(z/2)+1); the 0.5 pre-scale of i/f/o lives in the
    # packed weights, so one full-vreg tanh + full-vreg affine covers all gates.
    lane = jax.lax.broadcasted_iota(jnp.int32, (1, glanes), 1)
    is_ifo = lane < 3 * gp
    scale = jnp.where(is_ifo, jnp.float32(0.5), jnp.float32(1.0))
    shift = jnp.where(is_ifo, jnp.float32(0.5), jnp.float32(0.0))

    h = s0_ref[pl.ds(0, 1), :]                       # (1, GP)
    c = s0_ref[pl.ds(1, 1), :]                       # (1, GP)

    for t in range(T):                               # static unroll, static indices
        gates = (xw_ref[pl.ds(t, 1), :]
                 + jnp.dot(h, wh, preferred_element_type=jnp.float32))   # (1, 128)
        act = jnp.tanh(gates) * scale + shift        # one EUP push per step
        i = act[:, 0 * gp:1 * gp]
        f = act[:, 1 * gp:2 * gp]
        o = act[:, 2 * gp:3 * gp]
        g = act[:, 3 * gp:4 * gp]
        c = f * c + i * g
        h = o * jnp.tanh(c)
        hseq_ref[pl.ds(t, 1), :] = h                 # stash for the batched head

    sN_ref[pl.ds(0, 1), :] = h
    sN_ref[pl.ds(1, 1), :] = c

    # ---- batched output head -------------------------------------------------
    # lanes [0,GP) of `head` = w_out (zero-padded); lanes [GP,2GP) = one-hot
    # bias row (b_out in its lane 0), so a single lane-reduce folds the bias in.
    w_row = head[:, 0:gp]                            # (1, GP)
    b_row = head[:, gp:2 * gp]                       # (1, GP)
    y_ref[...] = jnp.sum(hseq_ref[...] * w_row + b_row, axis=-1, keepdims=True)


def init_params(key, input_size, hidden=HIDDEN):
    """nn.LSTM / nn.Linear-shaped init + packing into the lane-padded slab."""
    ks = jax.random.split(key, 6)
    bound = float(1.0 / (hidden ** 0.5))
    w_ih = jax.random.uniform(ks[0], (4 * hidden, input_size), jnp.float32, -bound, bound)
    w_hh = jax.random.uniform(ks[1], (4 * hidden, hidden), jnp.float32, -bound, bound)
    b_ih = jax.random.uniform(ks[2], (4 * hidden,), jnp.float32, -bound, bound)
    b_hh = jax.random.uniform(ks[3], (4 * hidden,), jnp.float32, -bound, bound)
    w_out = jax.random.uniform(ks[4], (1, hidden), jnp.float32, -bound, bound)
    b_out = jax.random.uniform(ks[5], (1,), jnp.float32, -bound, bound)

    in_pad = max(8, ((input_size + 7) // 8) * 8)

    # torch gate row order is (i, f, g, o); kernel lane-block order is
    # (i, f, o, g), each gate padded to GP lanes; i/f/o pre-scaled by 0.5 for
    # the sigmoid-via-tanh identity.
    torch_idx = {"i": 0, "f": 1, "g": 2, "o": 3}
    blocks = (("i", 0.5), ("f", 0.5), ("o", 0.5), ("g", 1.0))

    wx_p = jnp.zeros((in_pad, GLANES), jnp.float32)
    wh_p = jnp.zeros((GP, GLANES), jnp.float32)
    b_p = jnp.zeros((1, GLANES), jnp.float32)
    b_sum = b_ih + b_hh
    for blk, (name, s) in enumerate(blocks):
        k = torch_idx[name]
        rows = slice(k * hidden, (k + 1) * hidden)
        cols = slice(blk * GP, blk * GP + hidden)
        wx_p = wx_p.at[:input_size, cols].set(s * w_ih[rows].T)
        wh_p = wh_p.at[:hidden, cols].set(s * w_hh[rows].T)
        b_p = b_p.at[0, cols].set(s * b_sum[rows])

    head = jnp.zeros((1, GLANES), jnp.float32)
    head = head.at[0, :hidden].set(w_out[0])
    head = head.at[0, GP].set(b_out[0])

    slab = jnp.concatenate([wx_p, wh_p, b_p, head], axis=0)   # (in_pad+GP+2, 128)

    return {
        "slab": slab, "in_pad": in_pad,
        # raw copies kept for the pure-JAX reference
        "_w_ih": w_ih, "_w_hh": w_hh, "_b_ih": b_ih, "_b_hh": b_hh,
        "_w_out": w_out, "_b_out": b_out,
    }


def lstm_forward(x, h_state, c_state, params):
    """Matches LSTM.forward: returns (outputs (1,T,1), h_state (1,1,H), c_state (1,1,H))."""
    assert x.shape[0] == 1, "module indexes r_out[0, :] -> batch must be 1"
    B, T, I = x.shape
    H = h_state.shape[-1]
    in_pad = params["in_pad"]

    x_pad = jnp.zeros((T, in_pad), jnp.float32).at[:, :I].set(x[0])
    s0 = (jnp.zeros((2, GP), jnp.float32)
          .at[0, :H].set(h_state.reshape(H))
          .at[1, :H].set(c_state.reshape(H)))

    y, sN = pl.pallas_call(
        lstm_kernel,
        out_shape=(
            jax.ShapeDtypeStruct((T, 1), jnp.float32),
            jax.ShapeDtypeStruct((2, GP), jnp.float32),
        ),
        in_specs=[pl.BlockSpec(memory_space=pltpu.MemorySpace.VMEM)] * 3,
        out_specs=(
            pl.BlockSpec(memory_space=pltpu.MemorySpace.VMEM),
            pl.BlockSpec(memory_space=pltpu.MemorySpace.VMEM),
        ),
        scratch_shapes=[
            pltpu.VMEM((T, GLANES), jnp.float32),   # xw = x @ Wx + b
            pltpu.VMEM((T, GP), jnp.float32),       # all hidden states
        ],
    )(x_pad, params["slab"], s0)

    outputs = y[None, :, :]                          # unsqueeze(0) -> (1, T, 1)
    hN = sN[0, :H].reshape(1, 1, H)
    cN = sN[1, :H].reshape(1, 1, H)
    return outputs, hN, cN


def lstm_forward_ref(x, h_state, c_state, params):
    """Pure-JAX reference replicating torch.nn.LSTM + Linear exactly."""
    H = h_state.shape[-1]
    w_ih, w_hh = params["_w_ih"], params["_w_hh"]
    b = params["_b_ih"] + params["_b_hh"]
    h, c = h_state.reshape(H), c_state.reshape(H)
    ys = []
    for t in range(x.shape[1]):
        xt = x[0, t]
        gates = w_ih @ xt + w_hh @ h + b
        i = jax.nn.sigmoid(gates[0 * H:1 * H])
        f = jax.nn.sigmoid(gates[1 * H:2 * H])
        g = jnp.tanh(gates[2 * H:3 * H])
        o = jax.nn.sigmoid(gates[3 * H:4 * H])
        c = f * c + i * g
        h = o * jnp.tanh(c)
        ys.append(params["_w_out"] @ h + params["_b_out"])
    outputs = jnp.stack(ys)[None]                    # (1, T, 1)
    return outputs, h.reshape(1, 1, H), c.reshape(1, 1, H)


if __name__ == "__main__":
    INPUT_SIZE = 4
    SEQ = 8
    key = jax.random.PRNGKey(0)
    k_p, k_x, k_h, k_c = jax.random.split(key, 4)

    params = init_params(k_p, INPUT_SIZE)
    x = jax.random.normal(k_x, (1, SEQ, INPUT_SIZE), jnp.float32)   # batch_first
    h_state = jax.random.normal(k_h, (1, 1, HIDDEN), jnp.float32)   # InitHidden()
    c_state = jax.random.normal(k_c, (1, 1, HIDDEN), jnp.float32)

    outputs, hN, cN = lstm_forward(x, h_state, c_state, params)
    jax.block_until_ready((outputs, hN, cN))

    ref_out, ref_h, ref_c = lstm_forward_ref(x, h_state, c_state, params)
    assert outputs.shape == (1, SEQ, 1) and hN.shape == (1, 1, HIDDEN) and cN.shape == (1, 1, HIDDEN)
    assert jnp.allclose(outputs, ref_out, atol=1e-5)
    assert jnp.allclose(hN, ref_h, atol=1e-5)
    assert jnp.allclose(cN, ref_c, atol=1e-5)

    print("KERNEL_OK")
</pallas_src>

<mosaic_0001>
module attributes {stable_mosaic.version = 11 : i64} {
  func.func @lstm_kernel(%arg0: memref<8x8xf32, #tpu.memory_space<vmem>>, %arg1: memref<42x128xf32, #tpu.memory_space<vmem>>, %arg2: memref<2x32xf32, #tpu.memory_space<vmem>>, %arg3: memref<8x1xf32, #tpu.memory_space<vmem>>, %arg4: memref<2x32xf32, #tpu.memory_space<vmem>>, %arg5: memref<8x128xf32, #tpu.memory_space<vmem>>, %arg6: memref<8x32xf32, #tpu.memory_space<vmem>>) attributes {dimension_semantics = [], scalar_prefetch = 0 : i64, scratch_operands = 2 : i64, tpu.core_type = #tpu.core_type<tc>} {
    %c0 = arith.constant 0 : index
    %c0_0 = arith.constant 0 : index
    %0 = vector.load %arg1[%c0, %c0_0] : memref<42x128xf32, #tpu.memory_space<vmem>>, vector<8x128xf32>
    %c8 = arith.constant 8 : index
    %c0_1 = arith.constant 0 : index
    %1 = vector.load %arg1[%c8, %c0_1] : memref<42x128xf32, #tpu.memory_space<vmem>>, vector<32x128xf32>
    %c40 = arith.constant 40 : index
    %c0_2 = arith.constant 0 : index
    %2 = vector.load %arg1[%c40, %c0_2] : memref<42x128xf32, #tpu.memory_space<vmem>>, vector<1x128xf32>
    %c41 = arith.constant 41 : index
    %c0_3 = arith.constant 0 : index
    %3 = vector.load %arg1[%c41, %c0_3] : memref<42x128xf32, #tpu.memory_space<vmem>>, vector<1x128xf32>
    %c0_4 = arith.constant 0 : index
    %c0_5 = arith.constant 0 : index
    %4 = vector.load %arg0[%c0_4, %c0_5] : memref<8x8xf32, #tpu.memory_space<vmem>>, vector<8x8xf32>
    %cst = arith.constant dense<0.000000e+00> : vector<8x128xf32>
    %5 = tpu.matmul %4, %0, %cst {dimension_numbers = #tpu.dot_dimension_numbers<[1], [0], [0], [1], [0, 0, 1, 1], [], []>} : vector<8x8xf32>, vector<8x128xf32>, vector<8x128xf32> -> vector<8x128xf32>
    %6 = vector.broadcast %2 : vector<1x128xf32> to vector<8x128xf32>
    %7 = arith.addf %5, %6 : vector<8x128xf32>
    %c0_6 = arith.constant 0 : index
    %c0_7 = arith.constant 0 : index
    %8 = vector.load %arg5[%c0_6, %c0_7] : memref<8x128xf32, #tpu.memory_space<vmem>>, vector<8x128xf32>
    tpu.vector_store %arg5[%c0_6, %c0_7], %7 {strides = array<i32>} : memref<8x128xf32, #tpu.memory_space<vmem>>, vector<8x128xf32>,
    %9 = tpu.iota {dimensions = array<i32: 1>} : vector<1x128xi32>
    %c96_i32 = arith.constant 96 : i32
    %10 = vector.broadcast %c96_i32 : i32 to vector<1x128xi32>
    %11 = arith.cmpi slt, %9, %10 : vector<1x128xi32>
    %cst_8 = arith.constant 5.000000e-01 : f32
    %cst_9 = arith.constant 1.000000e+00 : f32
    %12 = vector.broadcast %cst_8 : f32 to vector<1x128xf32>
    %13 = vector.broadcast %cst_9 : f32 to vector<1x128xf32>
    %14 = arith.select %11, %12, %13 : vector<1x128xi1>, vector<1x128xf32>
    %cst_10 = arith.constant 5.000000e-01 : f32
    %cst_11 = arith.constant 0.000000e+00 : f32
    %15 = vector.broadcast %cst_10 : f32 to vector<1x128xf32>
    %16 = vector.broadcast %cst_11 : f32 to vector<1x128xf32>
    %17 = arith.select %11, %15, %16 : vector<1x128xi1>, vector<1x128xf32>
    %c0_12 = arith.constant 0 : index
    %c0_13 = arith.constant 0 : index
    %18 = vector.load %arg2[%c0_12, %c0_13] : memref<2x32xf32, #tpu.memory_space<vmem>>, vector<1x32xf32>
    %c1 = arith.constant 1 : index
    %c0_14 = arith.constant 0 : index
    %19 = vector.load %arg2[%c1, %c0_14] : memref<2x32xf32, #tpu.memory_space<vmem>>, vector<1x32xf32>
    %c0_15 = arith.constant 0 : index
    %c0_16 = arith.constant 0 : index
    %20 = vector.load %arg5[%c0_15, %c0_16] : memref<8x128xf32, #tpu.memory_space<vmem>>, vector<1x128xf32>
    %cst_17 = arith.constant dense<0.000000e+00> : vector<1x128xf32>
    %21 = tpu.matmul %18, %1, %cst_17 {dimension_numbers = #tpu.dot_dimension_numbers<[1], [0], [0], [1], [0, 0, 1, 1], [], []>} : vector<1x32xf32>, vector<32x128xf32>, vector<1x128xf32> -> vector<1x128xf32>
    %22 = arith.addf %20, %21 : vector<1x128xf32>
    %23 = math.tanh %22 : vector<1x128xf32>
    %24 = arith.mulf %23, %14 : vector<1x128xf32>
    %25 = arith.addf %24, %17 : vector<1x128xf32>
    %26 = vector.extract_strided_slice %25 {offsets = [0, 0], sizes = [1, 32], strides = [1, 1]} : vector<1x128xf32> to vector<1x32xf32>
    %27 = vector.extract_strided_slice %25 {offsets = [0, 32], sizes = [1, 32], strides = [1, 1]} : vector<1x128xf32> to vector<1x32xf32>
    %28 = vector.extract_strided_slice %25 {offsets = [0, 64], sizes = [1, 32], strides = [1, 1]} : vector<1x128xf32> to vector<1x32xf32>
    %29 = vector.extract_strided_slice %25 {offsets = [0, 96], sizes = [1, 32], strides = [1, 1]} : vector<1x128xf32> to vector<1x32xf32>
    %30 = arith.mulf %27, %19 : vector<1x32xf32>
    %31 = arith.mulf %26, %29 : vector<1x32xf32>
    %32 = arith.addf %30, %31 : vector<1x32xf32>
    %33 = math.tanh %32 : vector<1x32xf32>
    %34 = arith.mulf %28, %33 : vector<1x32xf32>
    %c0_18 = arith.constant 0 : index
    %c0_19 = arith.constant 0 : index
    %35 = vector.load %arg6[%c0_18, %c0_19] : memref<8x32xf32, #tpu.memory_space<vmem>>, vector<1x32xf32>
    tpu.vector_store %arg6[%c0_18, %c0_19], %34 {strides = array<i32>} : memref<8x32xf32, #tpu.memory_space<vmem>>, vector<1x32xf32>,
    %c1_20 = arith.constant 1 : index
    %c0_21 = arith.constant 0 : index
    %36 = vector.load %arg5[%c1_20, %c0_21] : memref<8x128xf32, #tpu.memory_space<vmem>>, vector<1x128xf32>
    %cst_22 = arith.constant dense<0.000000e+00> : vector<1x128xf32>
    %37 = tpu.matmul %34, %1, %cst_22 {dimension_numbers = #tpu.dot_dimension_numbers<[1], [0], [0], [1], [0, 0, 1, 1], [], []>} : vector<1x32xf32>, vector<32x128xf32>, vector<1x128xf32> -> vector<1x128xf32>
    %38 = arith.addf %36, %37 : vector<1x128xf32>
    %39 = math.tanh %38 : vector<1x128xf32>
    %40 = arith.mulf %39, %14 : vector<1x128xf32>
    %41 = arith.addf %40, %17 : vector<1x128xf32>
    %42 = vector.extract_strided_slice %41 {offsets = [0, 0], sizes = [1, 32], strides = [1, 1]} : vector<1x128xf32> to vector<1x32xf32>
    %43 = vector.extract_strided_slice %41 {offsets = [0, 32], sizes = [1, 32], strides = [1, 1]} : vector<1x128xf32> to vector<1x32xf32>
    %44 = vector.extract_strided_slice %41 {offsets = [0, 64], sizes = [1, 32], strides = [1, 1]} : vector<1x128xf32> to vector<1x32xf32>
    %45 = vector.extract_strided_slice %41 {offsets = [0, 96], sizes = [1, 32], strides = [1, 1]} : vector<1x128xf32> to vector<1x32xf32>
    %46 = arith.mulf %43, %32 : vector<1x32xf32>
    %47 = arith.mulf %42, %45 : vector<1x32xf32>
    %48 = arith.addf %46, %47 : vector<1x32xf32>
    %49 = math.tanh %48 : vector<1x32xf32>
    %50 = arith.mulf %44, %49 : vector<1x32xf32>
    %c1_23 = arith.constant 1 : index
    %c0_24 = arith.constant 0 : index
    %51 = vector.load %arg6[%c1_23, %c0_24] : memref<8x32xf32, #tpu.memory_space<vmem>>, vector<1x32xf32>
    tpu.vector_store %arg6[%c1_23, %c0_24], %50 {strides = array<i32>} : memref<8x32xf32, #tpu.memory_space<vmem>>, vector<1x32xf32>,
    %c2 = arith.constant 2 : index
    %c0_25 = arith.constant 0 : index
    %52 = vector.load %arg5[%c2, %c0_25] : memref<8x128xf32, #tpu.memory_space<vmem>>, vector<1x128xf32>
    %cst_26 = arith.constant dense<0.000000e+00> : vector<1x128xf32>
    %53 = tpu.matmul %50, %1, %cst_26 {dimension_numbers = #tpu.dot_dimension_numbers<[1], [0], [0], [1], [0, 0, 1, 1], [], []>} : vector<1x32xf32>, vector<32x128xf32>, vector<1x128xf32> -> vector<1x128xf32>
    %54 = arith.addf %52, %53 : vector<1x128xf32>
    %55 = math.tanh %54 : vector<1x128xf32>
    %56 = arith.mulf %55, %14 : vector<1x128xf32>
    %57 = arith.addf %56, %17 : vector<1x128xf32>
    %58 = vector.extract_strided_slice %57 {offsets = [0, 0], sizes = [1, 32], strides = [1, 1]} : vector<1x128xf32> to vector<1x32xf32>
    %59 = vector.extract_strided_slice %57 {offsets = [0, 32], sizes = [1, 32], strides = [1, 1]} : vector<1x128xf32> to vector<1x32xf32>
    %60 = vector.extract_strided_slice %57 {offsets = [0, 64], sizes = [1, 32], strides = [1, 1]} : vector<1x128xf32> to vector<1x32xf32>
    %61 = vector.extract_strided_slice %57 {offsets = [0, 96], sizes = [1, 32], strides = [1, 1]} : vector<1x128xf32> to vector<1x32xf32>
    %62 = arith.mulf %59, %48 : vector<1x32xf32>
    %63 = arith.mulf %58, %61 : vector<1x32xf32>
    %64 = arith.addf %62, %63 : vector<1x32xf32>
    %65 = math.tanh %64 : vector<1x32xf32>
    %66 = arith.mulf %60, %65 : vector<1x32xf32>
    %c2_27 = arith.constant 2 : index
    %c0_28 = arith.constant 0 : index
    %67 = vector.load %arg6[%c2_27, %c0_28] : memref<8x32xf32, #tpu.memory_space<vmem>>, vector<1x32xf32>
    tpu.vector_store %arg6[%c2_27, %c0_28], %66 {strides = array<i32>} : memref<8x32xf32, #tpu.memory_space<vmem>>, vector<1x32xf32>,
    %c3 = arith.constant 3 : index
    %c0_29 = arith.constant 0 : index
    %68 = vector.load %arg5[%c3, %c0_29] : memref<8x128xf32, #tpu.memory_space<vmem>>, vector<1x128xf32>
    %cst_30 = arith.constant dense<0.000000e+00> : vector<1x128xf32>
    %69 = tpu.matmul %66, %1, %cst_30 {dimension_numbers = #tpu.dot_dimension_numbers<[1], [0], [0], [1], [0, 0, 1, 1], [], []>} : vector<1x32xf32>, vector<32x128xf32>, vector<1x128xf32> -> vector<1x128xf32>
    %70 = arith.addf %68, %69 : vector<1x128xf32>
    %71 = math.tanh %70 : vector<1x128xf32>
    %72 = arith.mulf %71, %14 : vector<1x128xf32>
    %73 = arith.addf %72, %17 : vector<1x128xf32>
    %74 = vector.extract_strided_slice %73 {offsets = [0, 0], sizes = [1, 32], strides = [1, 1]} : vector<1x128xf32> to vector<1x32xf32>
    %75 = vector.extract_strided_slice %73 {offsets = [0, 32], sizes = [1, 32], strides = [1, 1]} : vector<1x128xf32> to vector<1x32xf32>
    %76 = vector.extract_strided_slice %73 {offsets = [0, 64], sizes = [1, 32], strides = [1, 1]} : vector<1x128xf32> to vector<1x32xf32>
    %77 = vector.extract_strided_slice %73 {offsets = [0, 96], sizes = [1, 32], strides = [1, 1]} : vector<1x128xf32> to vector<1x32xf32>
    %78 = arith.mulf %75, %64 : vector<1x32xf32>
    %79 = arith.mulf %74, %77 : vector<1x32xf32>
    %80 = arith.addf %78, %79 : vector<1x32xf32>
    %81 = math.tanh %80 : vector<1x32xf32>
    %82 = arith.mulf %76, %81 : vector<1x32xf32>
    %c3_31 = arith.constant 3 : index
    %c0_32 = arith.constant 0 : index
    %83 = vector.load %arg6[%c3_31, %c0_32] : memref<8x32xf32, #tpu.memory_space<vmem>>, vector<1x32xf32>
    tpu.vector_store %arg6[%c3_31, %c0_32], %82 {strides = array<i32>} : memref<8x32xf32, #tpu.memory_space<vmem>>, vector<1x32xf32>,
    %c4 = arith.constant 4 : index
    %c0_33 = arith.constant 0 : index
    %84 = vector.load %arg5[%c4, %c0_33] : memref<8x128xf32, #tpu.memory_space<vmem>>, vector<1x128xf32>
    %cst_34 = arith.constant dense<0.000000e+00> : vector<1x128xf32>
    %85 = tpu.matmul %82, %1, %cst_34 {dimension_numbers = #tpu.dot_dimension_numbers<[1], [0], [0], [1], [0, 0, 1, 1], [], []>} : vector<1x32xf32>, vector<32x128xf32>, vector<1x128xf32> -> vector<1x128xf32>
    %86 = arith.addf %84, %85 : vector<1x128xf32>
    %87 = math.tanh %86 : vector<1x128xf32>
    %88 = arith.mulf %87, %14 : vector<1x128xf32>
    %89 = arith.addf %88, %17 : vector<1x128xf32>
    %90 = vector.extract_strided_slice %89 {offsets = [0, 0], sizes = [1, 32], strides = [1, 1]} : vector<1x128xf32> to vector<1x32xf32>
    %91 = vector.extract_strided_slice %89 {offsets = [0, 32], sizes = [1, 32], strides = [1, 1]} : vector<1x128xf32> to vector<1x32xf32>
    %92 = vector.extract_strided_slice %89 {offsets = [0, 64], sizes = [1, 32], strides = [1, 1]} : vector<1x128xf32> to vector<1x32xf32>
    %93 = vector.extract_strided_slice %89 {offsets = [0, 96], sizes = [1, 32], strides = [1, 1]} : vector<1x128xf32> to vector<1x32xf32>
    %94 = arith.mulf %91, %80 : vector<1x32xf32>
    %95 = arith.mulf %90, %93 : vector<1x32xf32>
    %96 = arith.addf %94, %95 : vector<1x32xf32>
    %97 = math.tanh %96 : vector<1x32xf32>
    %98 = arith.mulf %92, %97 : vector<1x32xf32>
    %c4_35 = arith.constant 4 : index
    %c0_36 = arith.constant 0 : index
    %99 = vector.load %arg6[%c4_35, %c0_36] : memref<8x32xf32, #tpu.memory_space<vmem>>, vector<1x32xf32>
    tpu.vector_store %arg6[%c4_35, %c0_36], %98 {strides = array<i32>} : memref<8x32xf32, #tpu.memory_space<vmem>>, vector<1x32xf32>,
    %c5 = arith.constant 5 : index
    %c0_37 = arith.constant 0 : index
    %100 = vector.load %arg5[%c5, %c0_37] : memref<8x128xf32, #tpu.memory_space<vmem>>, vector<1x128xf32>
    %cst_38 = arith.constant dense<0.000000e+00> : vector<1x128xf32>
    %101 = tpu.matmul %98, %1, %cst_38 {dimension_numbers = #tpu.dot_dimension_numbers<[1], [0], [0], [1], [0, 0, 1, 1], [], []>} : vector<1x32xf32>, vector<32x128xf32>, vector<1x128xf32> -> vector<1x128xf32>
    %102 = arith.addf %100, %101 : vector<1x128xf32>
    %103 = math.tanh %102 : vector<1x128xf32>
    %104 = arith.mulf %103, %14 : vector<1x128xf32>
    %105 = arith.addf %104, %17 : vector<1x128xf32>
    %106 = vector.extract_strided_slice %105 {offsets = [0, 0], sizes = [1, 32], strides = [1, 1]} : vector<1x128xf32> to vector<1x32xf32>
    %107 = vector.extract_strided_slice %105 {offsets = [0, 32], sizes = [1, 32], strides = [1, 1]} : vector<1x128xf32> to vector<1x32xf32>
    %108 = vector.extract_strided_slice %105 {offsets = [0, 64], sizes = [1, 32], strides = [1, 1]} : vector<1x128xf32> to vector<1x32xf32>
    %109 = vector.extract_strided_slice %105 {offsets = [0, 96], sizes = [1, 32], strides = [1, 1]} : vector<1x128xf32> to vector<1x32xf32>
    %110 = arith.mulf %107, %96 : vector<1x32xf32>
    %111 = arith.mulf %106, %109 : vector<1x32xf32>
    %112 = arith.addf %110, %111 : vector<1x32xf32>
    %113 = math.tanh %112 : vector<1x32xf32>
    %114 = arith.mulf %108, %113 : vector<1x32xf32>
    %c5_39 = arith.constant 5 : index
    %c0_40 = arith.constant 0 : index
    %115 = vector.load %arg6[%c5_39, %c0_40] : memref<8x32xf32, #tpu.memory_space<vmem>>, vector<1x32xf32>
    tpu.vector_store %arg6[%c5_39, %c0_40], %114 {strides = array<i32>} : memref<8x32xf32, #tpu.memory_space<vmem>>, vector<1x32xf32>,
    %c6 = arith.constant 6 : index
    %c0_41 = arith.constant 0 : index
    %116 = vector.load %arg5[%c6, %c0_41] : memref<8x128xf32, #tpu.memory_space<vmem>>, vector<1x128xf32>
    %cst_42 = arith.constant dense<0.000000e+00> : vector<1x128xf32>
    %117 = tpu.matmul %114, %1, %cst_42 {dimension_numbers = #tpu.dot_dimension_numbers<[1], [0], [0], [1], [0, 0, 1, 1], [], []>} : vector<1x32xf32>, vector<32x128xf32>, vector<1x128xf32> -> vector<1x128xf32>
    %118 = arith.addf %116, %117 : vector<1x128xf32>
    %119 = math.tanh %118 : vector<1x128xf32>
    %120 = arith.mulf %119, %14 : vector<1x128xf32>
    %121 = arith.addf %120, %17 : vector<1x128xf32>
    %122 = vector.extract_strided_slice %121 {offsets = [0, 0], sizes = [1, 32], strides = [1, 1]} : vector<1x128xf32> to vector<1x32xf32>
    %123 = vector.extract_strided_slice %121 {offsets = [0, 32], sizes = [1, 32], strides = [1, 1]} : vector<1x128xf32> to vector<1x32xf32>
    %124 = vector.extract_strided_slice %121 {offsets = [0, 64], sizes = [1, 32], strides = [1, 1]} : vector<1x128xf32> to vector<1x32xf32>
    %125 = vector.extract_strided_slice %121 {offsets = [0, 96], sizes = [1, 32], strides = [1, 1]} : vector<1x128xf32> to vector<1x32xf32>
    %126 = arith.mulf %123, %112 : vector<1x32xf32>
    %127 = arith.mulf %122, %125 : vector<1x32xf32>
    %128 = arith.addf %126, %127 : vector<1x32xf32>
    %129 = math.tanh %128 : vector<1x32xf32>
    %130 = arith.mulf %124, %129 : vector<1x32xf32>
    %c6_43 = arith.constant 6 : index
    %c0_44 = arith.constant 0 : index
    %131 = vector.load %arg6[%c6_43, %c0_44] : memref<8x32xf32, #tpu.memory_space<vmem>>, vector<1x32xf32>
    tpu.vector_store %arg6[%c6_43, %c0_44], %130 {strides = array<i32>} : memref<8x32xf32, #tpu.memory_space<vmem>>, vector<1x32xf32>,
    %c7 = arith.constant 7 : index
    %c0_45 = arith.constant 0 : index
    %132 = vector.load %arg5[%c7, %c0_45] : memref<8x128xf32, #tpu.memory_space<vmem>>, vector<1x128xf32>
    %cst_46 = arith.constant dense<0.000000e+00> : vector<1x128xf32>
    %133 = tpu.matmul %130, %1, %cst_46 {dimension_numbers = #tpu.dot_dimension_numbers<[1], [0], [0], [1], [0, 0, 1, 1], [], []>} : vector<1x32xf32>, vector<32x128xf32>, vector<1x128xf32> -> vector<1x128xf32>
    %134 = arith.addf %132, %133 : vector<1x128xf32>
    %135 = math.tanh %134 : vector<1x128xf32>
    %136 = arith.mulf %135, %14 : vector<1x128xf32>
    %137 = arith.addf %136, %17 : vector<1x128xf32>
    %138 = vector.extract_strided_slice %137 {offsets = [0, 0], sizes = [1, 32], strides = [1, 1]} : vector<1x128xf32> to vector<1x32xf32>
    %139 = vector.extract_strided_slice %137 {offsets = [0, 32], sizes = [1, 32], strides = [1, 1]} : vector<1x128xf32> to vector<1x32xf32>
    %140 = vector.extract_strided_slice %137 {offsets = [0, 64], sizes = [1, 32], strides = [1, 1]} : vector<1x128xf32> to vector<1x32xf32>
    %141 = vector.extract_strided_slice %137 {offsets = [0, 96], sizes = [1, 32], strides = [1, 1]} : vector<1x128xf32> to vector<1x32xf32>
    %142 = arith.mulf %139, %128 : vector<1x32xf32>
    %143 = arith.mulf %138, %141 : vector<1x32xf32>
    %144 = arith.addf %142, %143 : vector<1x32xf32>
    %145 = math.tanh %144 : vector<1x32xf32>
    %146 = arith.mulf %140, %145 : vector<1x32xf32>
    %c7_47 = arith.constant 7 : index
    %c0_48 = arith.constant 0 : index
    %147 = vector.load %arg6[%c7_47, %c0_48] : memref<8x32xf32, #tpu.memory_space<vmem>>, vector<1x32xf32>
    tpu.vector_store %arg6[%c7_47, %c0_48], %146 {strides = array<i32>} : memref<8x32xf32, #tpu.memory_space<vmem>>, vector<1x32xf32>,
    %c0_49 = arith.constant 0 : index
    %c0_50 = arith.constant 0 : index
    %148 = vector.load %arg4[%c0_49, %c0_50] : memref<2x32xf32, #tpu.memory_space<vmem>>, vector<1x32xf32>
    tpu.vector_store %arg4[%c0_49, %c0_50], %146 {strides = array<i32>} : memref<2x32xf32, #tpu.memory_space<vmem>>, vector<1x32xf32>,
    %c1_51 = arith.constant 1 : index
    %c0_52 = arith.constant 0 : index
    %149 = vector.load %arg4[%c1_51, %c0_52] : memref<2x32xf32, #tpu.memory_space<vmem>>, vector<1x32xf32>
    tpu.vector_store %arg4[%c1_51, %c0_52], %144 {strides = array<i32>} : memref<2x32xf32, #tpu.memory_space<vmem>>, vector<1x32xf32>,
    %150 = vector.extract_strided_slice %3 {offsets = [0, 0], sizes = [1, 32], strides = [1, 1]} : vector<1x128xf32> to vector<1x32xf32>
    %151 = vector.extract_strided_slice %3 {offsets = [0, 32], sizes = [1, 32], strides = [1, 1]} : vector<1x128xf32> to vector<1x32xf32>
    %c0_53 = arith.constant 0 : index
    %c0_54 = arith.constant 0 : index
    %152 = vector.load %arg6[%c0_53, %c0_54] : memref<8x32xf32, #tpu.memory_space<vmem>>, vector<8x32xf32>
    %153 = vector.broadcast %150 : vector<1x32xf32> to vector<8x32xf32>
    %154 = arith.mulf %152, %153 : vector<8x32xf32>
    %155 = vector.broadcast %151 : vector<1x32xf32> to vector<8x32xf32>
    %156 = arith.addf %154, %155 : vector<8x32xf32>
    %cst_55 = arith.constant dense<0.000000e+00> : vector<8xf32>
    %157 = vector.multi_reduction <add>, %156, %cst_55 [1] : vector<8x32xf32> to vector<8xf32>
    %158 = vector.shape_cast %157 : vector<8xf32> to vector<8x1xf32>
    %c0_56 = arith.constant 0 : index
    %c0_57 = arith.constant 0 : index
    %159 = vector.load %arg3[%c0_56, %c0_57] : memref<8x1xf32, #tpu.memory_space<vmem>>, vector<8x1xf32>
    tpu.vector_store %arg3[%c0_56, %c0_57], %158 {strides = array<i32>} : memref<8x1xf32, #tpu.memory_space<vmem>>, vector<8x1xf32>,
    return
  }
}

</mosaic_0001>

<bundles_post_ra>
// kernel: tpu_custom_call.1
= control target key start
LH: loop header
LB: loop body
LE: loop exit
PB: predicated region body
PF: predicated region fallthrough
CT: control target
= control target key end

     0   :  { %10 = vsyncpa [#allocation5], 0  ;;  %s1505_s0 = inlined_call_operand.hbm [shape: f32[8,8], index: 0, kind: input, shape index: {}]   ;;  %s1506_s1 = inlined_call_operand.hbm [shape: f32[42,128], index: 1, kind: input, shape index: {}]   ;;  %s1507_s2 = inlined_call_operand.vmem [shape: f32[2,32], index: 2, kind: input, shape index: {}]   ;;  %s1508_s3 = inlined_call_operand.vmem [shape: f32[8,1], index: 3, kind: output, shape index: {0}]   ;;  %s1509_s4 = inlined_call_operand.hbm [shape: f32[2,32], index: 4, kind: output, shape index: {1}]  }
   0x1   :  { %11 = vsyncpa [#allocation8], 0 }
   0x2   :  { %12 = vsyncpa [#allocation6], 0  ;;  %s1288_s15 = smov [#allocation4]   ;;  %s1289_s17 = smov [#allocation7]  }
   0x3   :  { %s19_s16 = sshll.u32 %s1288_s15, 4  ;;  %s28_s18 = sshll.u32 %s1289_s17, 4  ;;  %s20_s16 = int_to_ptr.vmem [resolvable:$true] %s19_s16  ;;  %s1325_s18 = int_to_ptr.vmem [resolvable:$true] %s28_s18 }
   0x4   :  { %s1216_s21 = scalar_lea.hbm %s1505_s0, 128 }
   0x5   :  { %p1217_p0 = scmp.ne.s32.totalorder %s1505_s0, %s1216_s21  ;;  %p1220_p1 = scmp.lt.u32.totalorder %s1216_s21, %s1505_s0 }
   0x7   :  { %p1222_p2 = pnand %p1220_p1, %p1217_p0 }
   0x9   :  { %1225 = shalt.err (!%p1222_p2)
}
   0xa   :  { %s1226_s26 = scalar_lea.vmem %s20_s16, 128  ;;  %p1231_p4 = scmp.lt.s32.totalorder %s20_s16, %s20_s16 }
   0xb   :  { %p1227_p3 = scmp.ne.s32.totalorder %s20_s16, %s1226_s26  ;;  %p1232_p5 = scmp.lt.s32.totalorder %s1226_s26, %s1226_s26 }
   0xd   :  { %p1233_p6 = por %p1232_p5, %p1231_p4 }
   0xf   :  { %p1234_p7 = pnand %p1233_p6, %p1227_p3 }
  0x11   :  { %1237 = shalt.err (!%p1234_p7)
}
  0x12   :  { %22 = dma.hbm_to_vmem [thread:$0]  %s1505_s0, 128, %s20_s16, [#allocation5]  }
  0x13   :  { %s1238_s5 = scalar_lea.hbm %s1506_s1, 768 }
  0x14   :  { %p1239_p8 = scmp.ne.s32.totalorder %s1506_s1, %s1238_s5  ;;  %p1242_p9 = scmp.lt.u32.totalorder %s1238_s5, %s1506_s1 }
  0x16   :  { %p1244_p10 = pnand %p1242_p9, %p1239_p8 }
  0x18   :  { %1247 = shalt.err (!%p1244_p10)
}
  0x19   :  { %s1248_s10 = scalar_lea.vmem %s1325_s18, 768  ;;  %p1253_p12 = scmp.lt.s32.totalorder %s1325_s18, %s1325_s18 }
  0x1a   :  { %p1249_p11 = scmp.ne.s32.totalorder %s1325_s18, %s1248_s10  ;;  %p1254_p13 = scmp.lt.s32.totalorder %s1248_s10, %s1248_s10 }
  0x1c   :  { %p1255_p0 = por %p1254_p13, %p1253_p12 }
  0x1e   :  { %p1256_p1 = pnand %p1255_p0, %p1249_p11 }
  0x20   :  { %1259 = shalt.err (!%p1256_p1)
}
  0x21   :  { %s1290_s0 = smov 128   ;;  %s1291_s11 = smov 8  }
  0x22   :  { %34 = dma.hbm_to_vmem [thread:$0]  %s1506_s1, 768, %s1325_s18, [#allocation8], %s1290_s0, %s1290_s0, %s1291_s11  }
  0x23   :  { %1282 = dma.done.wait [#allocation5], 128  }
  0x24   :  { %1283 = vsyncadd [#allocation5], 4294967168 }
  0x25   :  { %1284 = dma.done.wait [#allocation8], 768  }
  0x26   :  { %1285 = vsyncadd [#allocation8], 4294966528  ;;  %v1292_v0 = vmov 0.0   ;;  %vm1293_vm0 = vmmov 0   ;;  %v1294_v1 = vmov 0.0|0.0   ;;  %vm55_vm1 = vcmask 64512  }
  0x27   :  { %1031 = vmatprep.subr.mxu0 %v1292_v0  ;;  %1033 = vmatprep.mubr.msk.f32.mxu0 %vm1293_vm0, %v1292_v0  ;;  %v43_v2 = vld [vmem:[#allocation7] sm:$0xff]  ;;  %v50_v3 = vld [vmem:[#allocation4] sm:$0xff]  ;;  %v44_v4 = vld [vmem:[#allocation7 + $0x8] sm:$0xff]  ;;  %vm138_vm2 = vcmask 261120   ;;  %v130_v18 = vlaneseq  ;;  %v1295_v21 = vmov 1.0   ;;  %s1296_s15 = smov 32  }
  0x28   :  { %1124 = vmatprep.subr.bf16.mxu1 %v1294_v1  ;;  %1044 = vmatprep.mubr.msk.f32.mxu1 %vm1293_vm0, %v1292_v0  ;;  %v45_v5 = vld [vmem:[#allocation7 + $0x10] sm:$0xff]  ;;  %v46_v6 = vld [vmem:[#allocation7 + $0x18] sm:$0xff]  ;;  %v47_v7 = vld [vmem:[#allocation7 + $0x20] sm:$0xff]  ;;  %s1297_s18 = smov 64   ;;  %vm241_vm4 = vcmask 253952   ;;  %s1299_s19 = smov [#allocation9]  }
  0x29   :  { %1032 = vmatpush3.msra.mxu0 %v43_v2  ;;  %v1362_v8 = vpack.c.bf16 %v45_v5, %v44_v4  ;;  %v1368_v9 = vpack.c.bf16 %v47_v7, %v46_v6  ;;  %v135_v10 = vld [vmem:[%s1507_s2] sm:$0x1]  ;;  %v978_v11 = vld [vmem:[#allocation7 + $0x28] ss:$0 sm:$0xff]  ;;  %v131_v20 = vand.u32 127, %v130_v18  ;;  %s966_s20 = sshll.u32 %s1299_s19, 4  ;;  %s967_s20 = int_to_ptr.vmem [resolvable:$true] %s966_s20 }
  0x2a   :  { %1034 = vmatmul.mubr.msk.f32.vlgmr.msra.gmra.mrb[0].mxu0 %vm55_vm1, %v50_v3  ;;  %1130 = vmatprep.subr.bf16.mxu0 %v1294_v1  ;;  %v136_v27 = vld [vmem:[%s1507_s2 + $0x1] sm:$0x1]  ;;  %s1298_s2 = smov 96   ;;  %s1260_s21 = scalar_lea.vmem %s967_s20, 32 }
  0x2b   :  { %1055 = vmatprep.mubr.msk.f32.mxu0 %vm1293_vm0, %v1292_v0  ;;  %1126 = vmatpush3.bf16.msra.mxu1 %v1362_v8  ;;  %vm132_vm3 = vcmp.lt.s32.totalorder %v131_v20, 96  ;;  %p1261_p2 = scmp.ne.s32.totalorder %s967_s20, %s1260_s21  ;;  %p1265_p3 = scmp.lt.s32.totalorder %s967_s20, %s967_s20 }
  0x2c   :  { %1132 = vmatpush3.bf16.msra.mxu0 %v1362_v8  ;;  %1127 = vmatprep.subr.bf16.mxu1 %v1294_v1  ;;  %v1387_v22 = vsel %vm132_vm3, 0.5, %v1295_v21  ;;  %v1390_v24 = vsel %vm132_vm3, 0.5, %v1292_v0  ;;  %p1266_p4 = scmp.lt.s32.totalorder %s1260_s21, %s1260_s21 }
  0x2d   :  { %1133 = vmatprep.subr.bf16.mxu0 %v1294_v1 }
  0x2e   :  { %p1267_p5 = por %p1266_p4, %p1265_p3 }
  0x2f   :  { %1129 = vmatpush3.bf16.msra.mxu1 %v1368_v9 }
  0x30   :  { %1135 = vmatpush3.bf16.msra.mxu0 %v1368_v9  ;;  %1136 = vmatprep.subr.bf16.mxu1 %v1294_v1  ;;  %p1268_p6 = pnand %p1267_p5, %p1261_p2 }
  0x31   :  { %1142 = vmatprep.subr.bf16.mxu0 %v1294_v1 }
  0x32   :  { %1045 = vmatmul.mubr.msk.f32.vlgmr.msra.gmra.mrb[0].mxu1 %vm138_vm2, %v135_v10 }
  0x33   :  { %1138 = vmatpush3.bf16.msra.mxu1 %v1362_v8  ;;  %1066 = vmatprep.mubr.msk.f32.mxu1 %vm1293_vm0, %v1292_v0 }
  0x34   :  { %1139 = vmatprep.subr.bf16.mxu1 %v1294_v1 }
  0x37   :  { %1141 = vmatpush3.bf16.msra.mxu1 %v1368_v9 }
  0x38   :  { %1148 = vmatprep.subr.bf16.mxu1 %v1294_v1 }
  0xfd   :  { %v125_v12 = vpop.f32.mrb[0].mxu0 }
  0xfe   :  { %v126_v13 = vadd.f32 %v978_v11, %v125_v12  ;;  %v1035_v14 = vpop.f32.mrb[1].mxu0 }
 0x100   :  { %129 = vst [vmem:[#allocation2] sm:$0xff] %v126_v13 }
 0x105   :  { %v208_v15 = vpop.f32.mrb[0].mxu1 }
 0x106   :  { %v1046_v17 = vpop.f32.mrb[1].mxu1 }
 0x107   :  { %v137_v16 = vld [vmem:[#allocation2] sm:$0x1]  ;;  %v243_v38 = vld [vmem:[#allocation2 + $0x1] sm:$0x1]  ;;  %v342_v54 = vld [vmem:[#allocation2 + $0x2] sm:$0x1] }
 0x108   :  { %v212_v19 = vadd.f32 %v208_v15, %v137_v16  ;;  %v441_v10 = vld [vmem:[#allocation2 + $0x3] sm:$0x1] }
 0x10a   :  { %1184 = vtanh.f32 %v212_v19 }
 0x114   :  { %v1185_v23 = vpop.eup %1184 }
 0x115   :  { %v214_v25 = vmul.f32 %v1185_v23, %v1387_v22 }
 0x117   :  { %v215_v26 = vadd.f32 %v214_v25, %v1390_v24 }
 0x119   :  { %222 = vrot.lane.b32.xlu0 %v215_v26, %s1296_s15 }
 0x11d   :  { %217 = vrot.lane.b32.xlu0 %v136_v27, %s1296_s15 }
 0x18b   :  { %v223_v28 = vpop.permute.xlu0 %222 }
 0x18c   :  { %v225_v29 = vmul.f32 %v223_v28, %v215_v26  ;;  %v540_v28 = vld [vmem:[#allocation2 + $0x4] sm:$0x1] }
 0x18e   :  { %227 = vrot.lane.b32.xlu1 %v225_v29, %s1296_s15 }
 0x18f   :  { %v218_v30 = vpop.permute.xlu0 %217 }
 0x190   :  { %v220_v31 = vmul.f32 %v218_v30, %v215_v26 }
 0x200   :  { %v228_v32 = vpop.permute.xlu1 %227 }
 0x201   :  { %v230_v33 = vadd.f32 %v228_v32, %v220_v31 }
 0x203   :  { %1186 = vtanh.f32 %v230_v33 }
 0x20d   :  { %v1187_v34 = vpop.eup %1186 }
 0x20e   :  { %233 = vrot.lane.b32.xlu1 %v1187_v34, %s1296_s15 }
 0x280   :  { %v234_v35 = vpop.permute.xlu1 %233 }
 0x281   :  { %v236_v36 = vmul.f32 %v234_v35, %v215_v26 }
 0x283   :  { %238 = vrot.lane.b32.xlu0 %v236_v36, %s1297_s18 }
 0x2f5   :  { %v239_v37 = vpop.permute.xlu0 %238 }
 0x2f6   :  { %242 = vst.msk [vmem:[#allocation3] sm:$0x1] %vm241_vm4, %v239_v37  ;;  %1056 = vmatmul.mubr.msk.f32.vlgmr.msra.gmra.mrb[2].mxu0 %vm138_vm2, %v239_v37 }
 0x2f7   :  { %1144 = vmatpush3.bf16.msra.mxu0 %v1362_v8  ;;  %1077 = vmatprep.mubr.msk.f32.mxu0 %vm1293_vm0, %v1292_v0 }
 0x2f8   :  { %1145 = vmatprep.subr.bf16.mxu0 %v1294_v1 }
 0x2fb   :  { %1147 = vmatpush3.bf16.msra.mxu0 %v1368_v9 }
 0x2fc   :  { %1154 = vmatprep.subr.bf16.mxu0 %v1294_v1 }
 0x3c9   :  { %v312_v39 = vpop.f32.mrb[2].mxu0 }
 0x3ca   :  { %v316_v40 = vadd.f32 %v312_v39, %v243_v38  ;;  %v1057_v41 = vpop.f32.mrb[3].mxu0 }
 0x3cc   :  { %1188 = vtanh.f32 %v316_v40 }
 0x3d6   :  { %v1189_v42 = vpop.eup %1188 }
 0x3d7   :  { %v318_v43 = vmul.f32 %v1189_v42, %v1387_v22 }
 0x3d9   :  { %v319_v44 = vadd.f32 %v318_v43, %v1390_v24 }
 0x3db   :  { %322 = vrot.lane.b32.xlu1 %v319_v44, %s1296_s15  ;;  %v320_v47 = vmul.f32 %v319_v44, %v230_v33 }
 0x44d   :  { %v323_v45 = vpop.permute.xlu1 %322 }
 0x44e   :  { %v325_v46 = vmul.f32 %v323_v45, %v319_v44 }
 0x450   :  { %327 = vrot.lane.b32.xlu0 %v325_v46, %s1296_s15 }
 0x4c2   :  { %v328_v48 = vpop.permute.xlu0 %327 }
 0x4c3   :  { %v330_v49 = vadd.f32 %v328_v48, %v320_v47 }
 0x4c5   :  { %1190 = vtanh.f32 %v330_v49 }
 0x4cf   :  { %v1191_v50 = vpop.eup %1190 }
 0x4d0   :  { %333 = vrot.lane.b32.xlu1 %v1191_v50, %s1296_s15 }
 0x542   :  { %v334_v51 = vpop.permute.xlu1 %333 }
 0x543   :  { %v336_v52 = vmul.f32 %v334_v51, %v319_v44  ;;  %v639_v44 = vld [vmem:[#allocation2 + $0x5] sm:$0x1] }
 0x545   :  { %338 = vrot.lane.b32.xlu0 %v336_v52, %s1297_s18 }
 0x5b7   :  { %v339_v53 = vpop.permute.xlu0 %338 }
 0x5b8   :  { %341 = vst.msk [vmem:[#allocation3 + $0x1] sm:$0x1] %vm241_vm4, %v339_v53  ;;  %1067 = vmatmul.mubr.msk.f32.vlgmr.msra.gmra.mrb[2].mxu1 %vm138_vm2, %v339_v53 }
 0x5b9   :  { %1150 = vmatpush3.bf16.msra.mxu1 %v1362_v8  ;;  %1088 = vmatprep.mubr.msk.f32.mxu1 %vm1293_vm0, %v1292_v0 }
 0x5ba   :  { %1151 = vmatprep.subr.bf16.mxu1 %v1294_v1 }
 0x5bd   :  { %1153 = vmatpush3.bf16.msra.mxu1 %v1368_v9 }
 0x5be   :  { %1160 = vmatprep.subr.bf16.mxu1 %v1294_v1 }
 0x68b   :  { %v411_v55 = vpop.f32.mrb[2].mxu1 }
 0x68c   :  { %v415_v56 = vadd.f32 %v411_v55, %v342_v54  ;;  %v1068_v57 = vpop.f32.mrb[3].mxu1 }
 0x68e   :  { %1192 = vtanh.f32 %v415_v56  ;;  %v738_v56 = vld [vmem:[#allocation2 + $0x6] sm:$0x1] }
 0x698   :  { %v1193_v58 = vpop.eup %1192 }
 0x699   :  { %v417_v59 = vmul.f32 %v1193_v58, %v1387_v22 }
 0x69b   :  { %v418_v60 = vadd.f32 %v417_v59, %v1390_v24 }
 0x69d   :  { %421 = vrot.lane.b32.xlu1 %v418_v60, %s1296_s15  ;;  %v419_v63 = vmul.f32 %v418_v60, %v330_v49 }
 0x70f   :  { %v422_v61 = vpop.permute.xlu1 %421 }
 0x710   :  { %v424_v62 = vmul.f32 %v422_v61, %v418_v60 }
 0x712   :  { %426 = vrot.lane.b32.xlu0 %v424_v62, %s1296_s15 }
 0x784   :  { %v427_v2 = vpop.permute.xlu0 %426 }
 0x785   :  { %v429_v3 = vadd.f32 %v427_v2, %v419_v63 }
 0x787   :  { %1194 = vtanh.f32 %v429_v3 }
 0x791   :  { %v1195_v4 = vpop.eup %1194 }
 0x792   :  { %432 = vrot.lane.b32.xlu1 %v1195_v4, %s1296_s15 }
 0x804   :  { %v433_v5 = vpop.permute.xlu1 %432 }
 0x805   :  { %v435_v6 = vmul.f32 %v433_v5, %v418_v60 }
 0x807   :  { %437 = vrot.lane.b32.xlu0 %v435_v6, %s1297_s18 }
 0x879   :  { %v438_v7 = vpop.permute.xlu0 %437 }
 0x87a   :  { %440 = vst.msk [vmem:[#allocation3 + $0x2] sm:$0x1] %vm241_vm4, %v438_v7  ;;  %1078 = vmatmul.mubr.msk.f32.vlgmr.msra.gmra.mrb[4].mxu0 %vm138_vm2, %v438_v7 }
 0x87b   :  { %1156 = vmatpush3.bf16.msra.mxu0 %v1362_v8  ;;  %1099 = vmatprep.mubr.msk.f32.mxu0 %vm1293_vm0, %v1292_v0 }
 0x87c   :  { %1157 = vmatprep.subr.bf16.mxu0 %v1294_v1 }
 0x87f   :  { %1159 = vmatpush3.bf16.msra.mxu0 %v1368_v9 }
 0x880   :  { %1166 = vmatprep.subr.bf16.mxu0 %v1294_v1 }
 0x94d   :  { %v510_v11 = vpop.f32.mrb[4].mxu0 }
 0x94e   :  { %v514_v12 = vadd.f32 %v510_v11, %v441_v10  ;;  %v1079_v13 = vpop.f32.mrb[5].mxu0 }
 0x950   :  { %1196 = vtanh.f32 %v514_v12  ;;  %v837_v12 = vld [vmem:[#allocation2 + $0x7] sm:$0x1] }
 0x95a   :  { %v1197_v14 = vpop.eup %1196 }
 0x95b   :  { %v516_v15 = vmul.f32 %v1197_v14, %v1387_v22 }
 0x95d   :  { %v517_v16 = vadd.f32 %v516_v15, %v1390_v24 }
 0x95f   :  { %520 = vrot.lane.b32.xlu1 %v517_v16, %s1296_s15  ;;  %v518_v19 = vmul.f32 %v517_v16, %v429_v3 }
 0x9d1   :  { %v521_v17 = vpop.permute.xlu1 %520 }
 0x9d2   :  { %v523_v18 = vmul.f32 %v521_v17, %v517_v16 }
 0x9d4   :  { %525 = vrot.lane.b32.xlu0 %v523_v18, %s1296_s15 }
 0xa46   :  { %v526_v20 = vpop.permute.xlu0 %525 }
 0xa47   :  { %v528_v21 = vadd.f32 %v526_v20, %v518_v19 }
 0xa49   :  { %1198 = vtanh.f32 %v528_v21 }
 0xa53   :  { %v1199_v23 = vpop.eup %1198 }
 0xa54   :  { %531 = vrot.lane.b32.xlu1 %v1199_v23, %s1296_s15 }
 0xac6   :  { %v532_v25 = vpop.permute.xlu1 %531 }
 0xac7   :  { %v534_v26 = vmul.f32 %v532_v25, %v517_v16 }
 0xac9   :  { %536 = vrot.lane.b32.xlu0 %v534_v26, %s1297_s18 }
 0xb3b   :  { %v537_v27 = vpop.permute.xlu0 %536 }
 0xb3c   :  { %539 = vst.msk [vmem:[#allocation3 + $0x3] sm:$0x1] %vm241_vm4, %v537_v27  ;;  %1089 = vmatmul.mubr.msk.f32.vlgmr.msra.gmra.mrb[4].mxu1 %vm138_vm2, %v537_v27  ;;  %v988_v27 = vld [vmem:[#allocation7 + $0x29] ss:$0 sm:$0xff] }
 0xb3d   :  { %1162 = vmatpush3.bf16.msra.mxu1 %v1362_v8  ;;  %1110 = vmatprep.mubr.msk.f32.mxu1 %vm1293_vm0, %v1292_v0 }
 0xb3e   :  { %1163 = vmatprep.subr.bf16.mxu1 %v1294_v1 }
 0xb41   :  { %1165 = vmatpush3.bf16.msra.mxu1 %v1368_v9 }
 0xc0f   :  { %v609_v29 = vpop.f32.mrb[4].mxu1 }
 0xc10   :  { %v613_v30 = vadd.f32 %v609_v29, %v540_v28  ;;  %v1090_v31 = vpop.f32.mrb[5].mxu1 }
 0xc12   :  { %1200 = vtanh.f32 %v613_v30 }
 0xc1c   :  { %v1201_v32 = vpop.eup %1200 }
 0xc1d   :  { %v615_v33 = vmul.f32 %v1201_v32, %v1387_v22 }
 0xc1f   :  { %v616_v34 = vadd.f32 %v615_v33, %v1390_v24 }
 0xc21   :  { %619 = vrot.lane.b32.xlu1 %v616_v34, %s1296_s15  ;;  %v617_v37 = vmul.f32 %v616_v34, %v528_v21 }
 0xc93   :  { %v620_v35 = vpop.permute.xlu1 %619 }
 0xc94   :  { %v622_v36 = vmul.f32 %v620_v35, %v616_v34 }
 0xc96   :  { %624 = vrot.lane.b32.xlu0 %v622_v36, %s1296_s15 }
 0xd08   :  { %v625_v38 = vpop.permute.xlu0 %624 }
 0xd09   :  { %v627_v39 = vadd.f32 %v625_v38, %v617_v37 }
 0xd0b   :  { %1202 = vtanh.f32 %v627_v39 }
 0xd15   :  { %v1203_v40 = vpop.eup %1202 }
 0xd16   :  { %630 = vrot.lane.b32.xlu1 %v1203_v40, %s1296_s15 }
 0xd88   :  { %v631_v41 = vpop.permute.xlu1 %630 }
 0xd89   :  { %v633_v42 = vmul.f32 %v631_v41, %v616_v34 }
 0xd8b   :  { %635 = vrot.lane.b32.xlu0 %v633_v42, %s1297_s18 }
 0xdfd   :  { %v636_v43 = vpop.permute.xlu0 %635 }
 0xdfe   :  { %638 = vst.msk [vmem:[#allocation3 + $0x4] sm:$0x1] %vm241_vm4, %v636_v43  ;;  %1100 = vmatmul.mubr.msk.f32.vlgmr.msra.gmra.mrb[6].mxu0 %vm138_vm2, %v636_v43 }
 0xdff   :  { %1168 = vmatpush3.bf16.msra.mxu0 %v1362_v8  ;;  %1121 = vmatprep.mubr.msk.f32.mxu0 %vm1293_vm0, %v1292_v0 }
 0xe00   :  { %1169 = vmatprep.subr.bf16.mxu0 %v1294_v1 }
 0xe03   :  { %1171 = vmatpush3.bf16.msra.mxu0 %v1368_v9 }
 0xed1   :  { %v708_v45 = vpop.f32.mrb[6].mxu0 }
 0xed2   :  { %v712_v46 = vadd.f32 %v708_v45, %v639_v44  ;;  %v1101_v47 = vpop.f32.mrb[7].mxu0 }
 0xed4   :  { %1204 = vtanh.f32 %v712_v46 }
 0xede   :  { %v1205_v48 = vpop.eup %1204 }
 0xedf   :  { %v714_v49 = vmul.f32 %v1205_v48, %v1387_v22 }
 0xee1   :  { %v715_v50 = vadd.f32 %v714_v49, %v1390_v24 }
 0xee3   :  { %718 = vrot.lane.b32.xlu1 %v715_v50, %s1296_s15  ;;  %v716_v0 = vmul.f32 %v715_v50, %v627_v39 }
 0xf55   :  { %v719_v8 = vpop.permute.xlu1 %718 }
 0xf56   :  { %v721_v51 = vmul.f32 %v719_v8, %v715_v50 }
 0xf58   :  { %723 = vrot.lane.b32.xlu0 %v721_v51, %s1296_s15 }
 0xfca   :  { %v724_v1 = vpop.permute.xlu0 %723 }
 0xfcb   :  { %v726_v52 = vadd.f32 %v724_v1, %v716_v0 }
 0xfcd   :  { %1206 = vtanh.f32 %v726_v52 }
 0xfd7   :  { %v1207_v9 = vpop.eup %1206 }
 0xfd8   :  { %729 = vrot.lane.b32.xlu1 %v1207_v9, %s1296_s15 }
0x104a   :  { %v730_v53 = vpop.permute.xlu1 %729 }
0x104b   :  { %v732_v54 = vmul.f32 %v730_v53, %v715_v50 }
0x104d   :  { %734 = vrot.lane.b32.xlu0 %v732_v54, %s1297_s18 }
0x10bf   :  { %v735_v55 = vpop.permute.xlu0 %734 }
0x10c0   :  { %737 = vst.msk [vmem:[#allocation3 + $0x5] sm:$0x1] %vm241_vm4, %v735_v55  ;;  %1111 = vmatmul.mubr.msk.f32.vlgmr.msra.gmra.mrb[6].mxu1 %vm138_vm2, %v735_v55 }
0x1193   :  { %v807_v57 = vpop.f32.mrb[6].mxu1 }
0x1194   :  { %v811_v58 = vadd.f32 %v807_v57, %v738_v56  ;;  %v1112_v59 = vpop.f32.mrb[7].mxu1 }
0x1196   :  { %1208 = vtanh.f32 %v811_v58 }
0x11a0   :  { %v1209_v60 = vpop.eup %1208 }
0x11a1   :  { %v813_v61 = vmul.f32 %v1209_v60, %v1387_v22 }
0x11a3   :  { %v814_v62 = vadd.f32 %v813_v61, %v1390_v24 }
0x11a5   :  { %817 = vrot.lane.b32.xlu1 %v814_v62, %s1296_s15  ;;  %v815_v3 = vmul.f32 %v814_v62, %v726_v52 }
0x1217   :  { %v818_v63 = vpop.permute.xlu1 %817 }
0x1218   :  { %v820_v2 = vmul.f32 %v818_v63, %v814_v62 }
0x121a   :  { %822 = vrot.lane.b32.xlu0 %v820_v2, %s1296_s15 }
0x128c   :  { %v823_v4 = vpop.permute.xlu0 %822 }
0x128d   :  { %v825_v5 = vadd.f32 %v823_v4, %v815_v3 }
0x128f   :  { %1210 = vtanh.f32 %v825_v5 }
0x1299   :  { %v1211_v6 = vpop.eup %1210 }
0x129a   :  { %828 = vrot.lane.b32.xlu1 %v1211_v6, %s1296_s15 }
0x130c   :  { %v829_v7 = vpop.permute.xlu1 %828 }
0x130d   :  { %v831_v10 = vmul.f32 %v829_v7, %v814_v62 }
0x130f   :  { %833 = vrot.lane.b32.xlu0 %v831_v10, %s1297_s18 }
0x1381   :  { %v834_v11 = vpop.permute.xlu0 %833 }
0x1382   :  { %836 = vst.msk [vmem:[#allocation3 + $0x6] sm:$0x1] %vm241_vm4, %v834_v11  ;;  %1122 = vmatmul.mubr.msk.f32.vlgmr.msra.gmra.mrb[8].mxu0 %vm138_vm2, %v834_v11 }
0x1455   :  { %v906_v13 = vpop.f32.mrb[8].mxu0 }
0x1456   :  { %v910_v14 = vadd.f32 %v906_v13, %v837_v12  ;;  %v1123_v15 = vpop.f32.mrb[9].mxu0 }
0x1458   :  { %1212 = vtanh.f32 %v910_v14 }
0x1462   :  { %v1213_v16 = vpop.eup %1212 }
0x1463   :  { %v912_v17 = vmul.f32 %v1213_v16, %v1387_v22 }
0x1465   :  { %v913_v18 = vadd.f32 %v912_v17, %v1390_v24 }
0x1467   :  { %916 = vrot.lane.b32.xlu1 %v913_v18, %s1296_s15  ;;  %v914_v21 = vmul.f32 %v913_v18, %v825_v5 }
0x14d9   :  { %v917_v19 = vpop.permute.xlu1 %916 }
0x14da   :  { %v919_v20 = vmul.f32 %v917_v19, %v913_v18 }
0x14dc   :  { %921 = vrot.lane.b32.xlu0 %v919_v20, %s1296_s15 }
0x154e   :  { %v922_v23 = vpop.permute.xlu0 %921 }
0x154f   :  { %v924_v25 = vadd.f32 %v922_v23, %v914_v21 }
0x1551   :  { %1214 = vtanh.f32 %v924_v25 }
0x155b   :  { %v1215_v26 = vpop.eup %1214 }
0x155c   :  { %927 = vrot.lane.b32.xlu1 %v1215_v26, %s1296_s15 }
0x1560   :  { %949 = vrot.lane.b32.xlu1 %v988_v27, %s1298_s2 }
0x1564   :  { %938 = vrot.lane.b32.xlu1 %v924_v25, %s1298_s2 }
0x15ce   :  { %v928_v22 = vpop.permute.xlu1 %927 }
0x15cf   :  { %v930_v28 = vmul.f32 %v928_v22, %v913_v18 }
0x15d1   :  { %932 = vrot.lane.b32.xlu0 %v930_v28, %s1297_s18 }
0x15d2   :  { %v950_v24 = vpop.permute.xlu1 %949 }
0x15d6   :  { %v939_v29 = vpop.permute.xlu1 %938 }
0x15d7   :  { %941 = vst.msk [vmem:[#allocation9 + $0x1] sm:$0x1] %vm241_vm4, %v939_v29 }
0x1643   :  { %v933_v30 = vpop.permute.xlu0 %932 }
0x1644   :  { %935 = vst.msk [vmem:[#allocation3 + $0x7] sm:$0x1] %vm241_vm4, %v933_v30  ;;  %936 = vst.msk [vmem:[#allocation9] sm:$0x1] %vm241_vm4, %v933_v30 }
0x164b   :  { %v942_v31 = vld [vmem:[#allocation3] sm:$0xff] }
0x164c   :  { %v947_v32 = vmul.f32 %v988_v27, %v942_v31 }
0x164e   :  { %v952_v33 = vadd.f32 %v950_v24, %v947_v32 }
0x1650   :  { %v953_v34 = vsel %vm138_vm2, %v952_v33, 0.0 }
0x1651   :  { %954 = vadd.xlane.f32.xlu0 %v953_v34 }
0x1652   :  { %1271 = shalt.err (!%p1268_p6)
}
0x1653   :  { %s1272_s24 = scalar_lea.hbm %s1509_s4, 32 }
0x1654   :  { %p1273_p7 = scmp.ne.s32.totalorder %s1509_s4, %s1272_s24  ;;  %p1276_p8 = scmp.lt.u32.totalorder %s1272_s24, %s1509_s4 }
0x1656   :  { %p1278_p9 = pnand %p1276_p8, %p1273_p7 }
0x1658   :  { %1281 = shalt.err (!%p1278_p9)
}
0x1659   :  { %969 = dma.vmem_to_hbm [thread:$0]  %s967_s20, 32, %s1509_s4, [#allocation6]   ;;  %vm956_vm5 = vcmask 7168  }
0x16de   :  { %v955_v35 = vpop.xlane.xlu0 %954 }
0x16df   :  { %957 = vst.msk [vmem:[%s1508_s3] sm:$0xff] %vm956_vm5, %v955_v35 }
0x16e0   :  { %1286 = dma.done.wait [#allocation6], 32  }
0x16e1   :  { %1287 = vsyncadd [#allocation6], 4294967264 }
0x16e2   :  { %975 = vsyncpa [#allocation5], 1 }
0x16e3   :  { %976 = vsyncpa [#allocation8], 1 }
0x16e4   :  { %977 = vsyncpa [#allocation6], 1 }

</bundles_post_ra>
